<compile_context>
chip_gen: v5e
topology: v5e:2x2
jax: 0.10.0
libtpu: 0.0.40
codegen_flags: <defaults>
</compile_context>

<pallas_src>
import math

import jax
import jax.numpy as jnp
from jax.experimental import pallas as pl
from jax.experimental.pallas import tpu as pltpu

D_IN = 28 * 28   # 784
D_HID = 300
D_OUT = 10


def _round_up(x, m):
    return ((x + m - 1) // m) * m


# padded (lane-aligned) dims for the hidden / output axes only
D_HID_P = _round_up(D_HID, 128)  # 384
D_OUT_P = _round_up(D_OUT, 128)  # 128


def mlp_kernel(x_ref, w1_ref, b1_ref, w2_ref, b2_ref, o_ref):
    # fc1 + ReLU + fc2 fused; weights are grid-resident (constant index_map).
    # x is streamed in its native dtype; cast to the MXU input dtype in-kernel
    # (VPU cast, avoids a separate wrapper-side astype pass over HBM).
    x = x_ref[...].astype(w1_ref.dtype)                          # (TB, 784)
    h = jnp.dot(x, w1_ref[...], preferred_element_type=jnp.float32)
    h = jnp.maximum(h + b1_ref[...], 0.0)                        # bias + ReLU (f32)
    h = h.astype(w2_ref.dtype)                                   # back to MXU input dtype
    o = jnp.dot(h, w2_ref[...], preferred_element_type=jnp.float32)
    o_ref[...] = (o + b2_ref[...]).astype(o_ref.dtype)


def prepare_params(w1, b1, w2, b2, compute_dtype=jnp.bfloat16):
    """Pad/transpose/cast parameters ONCE (outside the per-call path).
    Zero padding is exact: padded hidden units get weight 0 / bias 0 ->
    relu(0)=0 -> contribute nothing to fc2; padded output columns are sliced off.
    Default compute dtype is bf16 (MXU-native, halves weight bytes); accumulation
    stays f32 inside the kernel."""
    w1t = jnp.zeros((D_IN, D_HID_P), compute_dtype).at[:, :D_HID].set(
        w1.T.astype(compute_dtype))
    b1p = jnp.zeros((1, D_HID_P), jnp.float32).at[0, :D_HID].set(
        b1.astype(jnp.float32))
    w2t = jnp.zeros((D_HID_P, D_OUT_P), compute_dtype).at[:D_HID, :D_OUT].set(
        w2.T.astype(compute_dtype))
    b2p = jnp.zeros((1, D_OUT_P), jnp.float32).at[0, :D_OUT].set(
        b2.astype(jnp.float32))
    return w1t, b1p, w2t, b2p


@jax.jit
def dnn_forward(x, w1t, b1p, w2t, b2p):
    """x: (B, 784) in f32 or bf16; padded params from prepare_params().
    Returns (B, 10) float32."""
    B = x.shape[0]

    # Batch tile: large enough to amortize the ~0.35 us per-grid-step overhead,
    # capped so double-buffered tiles stay well inside scoped VMEM on all chips
    # (2048 rows pure-bf16, 1024 rows if anything is f32). Always a multiple of 8
    # (sublane). For B > 64, force at least 2 grid steps so both TensorCores get
    # work on v7x megacore.
    itemsize = max(x.dtype.itemsize, w1t.dtype.itemsize)
    cap = 2048 if itemsize <= 2 else 1024
    if B > 64:
        tile_b = min(cap, _round_up((B + 1) // 2, 8))
    else:
        tile_b = _round_up(max(B, 1), 8)

    # No row padding: rely on Pallas partial-block handling for the last tile.
    # Garbage rows past B are never read back (no cross-row reduction) and the
    # OOB part of the output block write is masked; we slice [:B] below anyway.
    grid = (pl.cdiv(B, tile_b),)

    out_p = pl.pallas_call(
        mlp_kernel,
        out_shape=jax.ShapeDtypeStruct((B, D_OUT_P), jnp.float32),
        grid_spec=pltpu.PrefetchScalarGridSpec(
            num_scalar_prefetch=0,
            grid=grid,
            in_specs=[
                # x tile: last dim == full array dim (784) -> legal, no host-side
                # feature padding; Mosaic lane-pads in VMEM for free.
                pl.BlockSpec((tile_b, D_IN), lambda i: (i, 0)),
                pl.BlockSpec((D_IN, D_HID_P), lambda i: (0, 0)),    # W1T (resident)
                pl.BlockSpec((1, D_HID_P), lambda i: (0, 0)),       # b1
                pl.BlockSpec((D_HID_P, D_OUT_P), lambda i: (0, 0)), # W2T (resident)
                pl.BlockSpec((1, D_OUT_P), lambda i: (0, 0)),       # b2
            ],
            # 128-lane-wide output block -> unmasked vst stores.
            out_specs=pl.BlockSpec((tile_b, D_OUT_P), lambda i: (i, 0)),
        ),
        compiler_params=pltpu.CompilerParams(
            # batch tiles split across TCs (v7x); reduction-free grid.
            dimension_semantics=("parallel",),
            # no-op vs v6e/v7x scoped defaults; raises v5e 16 MiB -> 32 MiB so the
            # larger tiles fit with double buffering.
            vmem_limit_bytes=32 * 1024 * 1024,
        ),
    )(x, w1t, b1p, w2t, b2p)

    # If the consumer can take the (B, 128) padded slab, fuse this slice downstream
    # instead of materializing it (saves one small HBM pass).
    return out_p[:B, :D_OUT]


def init_params(key):
    """Deterministic init mirroring the PyTorch module:
    kaiming_uniform_(fan_in, relu) for weights -> U(-sqrt(6/fan_in), sqrt(6/fan_in));
    default nn.Linear bias init -> U(-1/sqrt(fan_in), 1/sqrt(fan_in))."""
    k1, k2, k3, k4 = jax.random.split(key, 4)

    bound_w1 = math.sqrt(6.0 / D_IN)
    w1 = jax.random.uniform(k1, (D_HID, D_IN), jnp.float32, -bound_w1, bound_w1)
    bound_b1 = 1.0 / math.sqrt(D_IN)
    b1 = jax.random.uniform(k2, (D_HID,), jnp.float32, -bound_b1, bound_b1)

    bound_w2 = math.sqrt(6.0 / D_HID)
    w2 = jax.random.uniform(k3, (D_OUT, D_HID), jnp.float32, -bound_w2, bound_w2)
    bound_b2 = 1.0 / math.sqrt(D_HID)
    b2 = jax.random.uniform(k4, (D_OUT,), jnp.float32, -bound_b2, bound_b2)

    return w1, b1, w2, b2


def reference_forward(x, w1, b1, w2, b2):
    h = jnp.maximum(x @ w1.T + b1, 0.0)
    return h @ w2.T + b2


if __name__ == "__main__":
    key = jax.random.PRNGKey(0)
    k_params, k_x, k_x2 = jax.random.split(key, 3)

    w1, b1, w2, b2 = init_params(k_params)

    # ---- small batch, f32 end-to-end (tight check vs JAX f32 reference) ----
    batch = 8
    x = jax.random.normal(k_x, (batch, D_IN), jnp.float32)

    params_f32 = prepare_params(w1, b1, w2, b2, jnp.float32)
    out = jax.block_until_ready(dnn_forward(x, *params_f32))
    ref = reference_forward(x, w1, b1, w2, b2)
    assert out.shape == (batch, D_OUT)
    assert jnp.allclose(out, ref, atol=1e-4, rtol=1e-4), "f32 mismatch vs JAX reference"

    # ---- default path: bf16 weights, f32 x streamed & cast in-kernel ----
    params_bf16 = prepare_params(w1, b1, w2, b2)   # bf16 default
    out_bf16 = jax.block_until_ready(dnn_forward(x, *params_bf16))
    assert out_bf16.shape == (batch, D_OUT)
    assert jnp.allclose(out_bf16, ref, atol=1e-1, rtol=1e-1), "bf16-weight path mismatch"

    # ---- bf16 x end-to-end + partial last block (B not a multiple of tile_b) ----
    batch2 = 100
    x2 = jax.random.normal(k_x2, (batch2, D_IN), jnp.float32)
    x2_bf16 = x2.astype(jnp.bfloat16)
    out2 = jax.block_until_ready(dnn_forward(x2_bf16, *params_bf16))
    ref2 = reference_forward(x2_bf16.astype(jnp.float32), w1, b1, w2, b2)
    assert out2.shape == (batch2, D_OUT)
    assert jnp.allclose(out2, ref2, atol=2e-1, rtol=2e-1), "bf16 end-to-end mismatch"

    print("KERNEL_OK")
</pallas_src>

<mosaic_0001>
module attributes {stable_mosaic.version = 11 : i64} {
  func.func @mlp_kernel(%arg0: i32, %arg1: memref<8x784xf32, #tpu.memory_space<vmem>>, %arg2: memref<784x384xf32, #tpu.memory_space<vmem>>, %arg3: memref<1x384xf32, #tpu.memory_space<vmem>>, %arg4: memref<384x128xf32, #tpu.memory_space<vmem>>, %arg5: memref<1x128xf32, #tpu.memory_space<vmem>>, %arg6: memref<8x128xf32, #tpu.memory_space<vmem>>) attributes {dimension_semantics = [#tpu.dimension_semantics<parallel>], iteration_bounds = array<i64: 1>, scalar_prefetch = 0 : i64, scratch_operands = 0 : i64, tpu.core_type = #tpu.core_type<tc>, window_params = [{transform_indices = @transform_0, window_bounds = array<i64: 8, 784>}, {pipeline_mode = #tpu.pipeline_mode<synchronous>, transform_indices = @transform_1, window_bounds = array<i64: 784, 384>}, {pipeline_mode = #tpu.pipeline_mode<synchronous>, transform_indices = @transform_2, window_bounds = array<i64: 1, 384>}, {pipeline_mode = #tpu.pipeline_mode<synchronous>, transform_indices = @transform_3, window_bounds = array<i64: 384, 128>}, {pipeline_mode = #tpu.pipeline_mode<synchronous>, transform_indices = @transform_4, window_bounds = array<i64: 1, 128>}, {transform_indices = @transform_5, window_bounds = array<i64: 8, 128>}]} {
    %c0 = arith.constant 0 : index
    %c0_0 = arith.constant 0 : index
    %0 = vector.load %arg1[%c0, %c0_0] : memref<8x784xf32, #tpu.memory_space<vmem>>, vector<8x784xf32>
    %c0_1 = arith.constant 0 : index
    %c0_2 = arith.constant 0 : index
    %1 = vector.load %arg2[%c0_1, %c0_2] : memref<784x384xf32, #tpu.memory_space<vmem>>, vector<784x384xf32>
    %cst = arith.constant dense<0.000000e+00> : vector<8x384xf32>
    %2 = tpu.matmul %0, %1, %cst {dimension_numbers = #tpu.dot_dimension_numbers<[1], [0], [0], [1], [0, 0, 1, 1], [], []>} : vector<8x784xf32>, vector<784x384xf32>, vector<8x384xf32> -> vector<8x384xf32>
    %c0_3 = arith.constant 0 : index
    %c0_4 = arith.constant 0 : index
    %3 = vector.load %arg3[%c0_3, %c0_4] : memref<1x384xf32, #tpu.memory_space<vmem>>, vector<1x384xf32>
    %4 = vector.broadcast %3 : vector<1x384xf32> to vector<8x384xf32>
    %5 = arith.addf %2, %4 : vector<8x384xf32>
    %cst_5 = arith.constant 0.000000e+00 : f32
    %6 = vector.broadcast %cst_5 : f32 to vector<8x384xf32>
    %7 = arith.maximumf %5, %6 : vector<8x384xf32>
    %c0_6 = arith.constant 0 : index
    %c0_7 = arith.constant 0 : index
    %8 = vector.load %arg4[%c0_6, %c0_7] : memref<384x128xf32, #tpu.memory_space<vmem>>, vector<384x128xf32>
    %cst_8 = arith.constant dense<0.000000e+00> : vector<8x128xf32>
    %9 = tpu.matmul %7, %8, %cst_8 {dimension_numbers = #tpu.dot_dimension_numbers<[1], [0], [0], [1], [0, 0, 1, 1], [], []>} : vector<8x384xf32>, vector<384x128xf32>, vector<8x128xf32> -> vector<8x128xf32>
    %c0_9 = arith.constant 0 : index
    %c0_10 = arith.constant 0 : index
    %10 = vector.load %arg5[%c0_9, %c0_10] : memref<1x128xf32, #tpu.memory_space<vmem>>, vector<1x128xf32>
    %11 = vector.broadcast %10 : vector<1x128xf32> to vector<8x128xf32>
    %12 = arith.addf %9, %11 : vector<8x128xf32>
    %c0_11 = arith.constant 0 : index
    %c0_12 = arith.constant 0 : index
    %13 = vector.load %arg6[%c0_11, %c0_12] : memref<8x128xf32, #tpu.memory_space<vmem>>, vector<8x128xf32>
    tpu.vector_store %arg6[%c0_11, %c0_12], %12 {strides = array<i32>} : memref<8x128xf32, #tpu.memory_space<vmem>>, vector<8x128xf32>,
    return
  }
  func.func @transform_0(%arg0: i32) -> (i32, i32) {
    %c0_i32 = arith.constant 0 : i32
    %c0_i32_0 = arith.constant 0 : i32
    return %arg0, %c0_i32 : i32, i32
  }
  func.func @transform_1(%arg0: i32) -> (i32, i32) {
    %c0_i32 = arith.constant 0 : i32
    %c0_i32_0 = arith.constant 0 : i32
    %c0_i32_1 = arith.constant 0 : i32
    return %c0_i32, %c0_i32_0 : i32, i32
  }
  func.func @transform_2(%arg0: i32) -> (i32, i32) {
    %c0_i32 = arith.constant 0 : i32
    %c0_i32_0 = arith.constant 0 : i32
    %c0_i32_1 = arith.constant 0 : i32
    return %c0_i32, %c0_i32_0 : i32, i32
  }
  func.func @transform_3(%arg0: i32) -> (i32, i32) {
    %c0_i32 = arith.constant 0 : i32
    %c0_i32_0 = arith.constant 0 : i32
    %c0_i32_1 = arith.constant 0 : i32
    return %c0_i32, %c0_i32_0 : i32, i32
  }
  func.func @transform_4(%arg0: i32) -> (i32, i32) {
    %c0_i32 = arith.constant 0 : i32
    %c0_i32_0 = arith.constant 0 : i32
    %c0_i32_1 = arith.constant 0 : i32
    return %c0_i32, %c0_i32_0 : i32, i32
  }
  func.func @transform_5(%arg0: i32) -> (i32, i32) {
    %c0_i32 = arith.constant 0 : i32
    %c0_i32_0 = arith.constant 0 : i32
    return %arg0, %c0_i32 : i32, i32
  }
}

</mosaic_0001>

<bundles_post_ra>
// kernel: dnn_forward.1
= control target key start
LH: loop header
LB: loop body
LE: loop exit
PB: predicated region body
PF: predicated region fallthrough
CT: control target
= control target key end

     0   :  { %10 = vsyncpa [#allocation3], 0  ;;  %s1228_s0 = inlined_call_operand.hbm [shape: f32[8,784], index: 0, kind: input, shape index: {}]   ;;  %s1229_s1 = inlined_call_operand.hbm [shape: f32[784,384], index: 1, kind: input, shape index: {}]   ;;  %s1230_s2 = inlined_call_operand.hbm [shape: f32[1,384], index: 2, kind: input, shape index: {}]   ;;  %s1231_s3 = inlined_call_operand.hbm [shape: f32[384,128], index: 3, kind: input, shape index: {}]   ;;  %s1232_s4 = inlined_call_operand.hbm [shape: f32[1,128], index: 4, kind: input, shape index: {}]   ;;  %s1233_s5 = inlined_call_operand.hbm [shape: f32[8,128], index: 5, kind: output, shape index: {}]  }
   0x1   :  { %11 = vsyncpa [#allocation6], 0 }
   0x2   :  { %12 = vsyncpa [#allocation9], 0  ;;  %s29_s20 = sshll.u32 %s1229_s1, 4  ;;  %s30_s20 = int_to_ptr.hbm [resolvable:$true] %s29_s20 }
   0x3   :  { %13 = vsyncpa [#allocation4], 0  ;;  %s1127_s21 = smov [#allocation5]   ;;  %s53_s25 = sshll.u32 %s1231_s3, 4  ;;  %s54_s25 = int_to_ptr.hbm [resolvable:$true] %s53_s25 }
   0x4   :  { %s31_s22 = sshll.u32 %s1127_s21, 4  ;;  %s1128_s26 = smov 384   ;;  %s32_s22 = int_to_ptr.vmem [resolvable:$true] %s31_s22 }
   0x5   :  { %s1129_s27 = smov 24   ;;  %s1130_s28 = smov [#allocation8]  }
   0x6   :  { %37 = dma.hbm_to_vmem [thread:$0]  %s30_s20, 37632, %s32_s22, [#allocation6], %s1128_s26, %s1128_s26, %s1129_s27  }
   0x7   :  { %s55_s29 = sshll.u32 %s1130_s28, 4  ;;  %s1131_s30 = smov 128   ;;  %s56_s29 = int_to_ptr.vmem [resolvable:$true] %s55_s29 }
   0x8   :  { %s1132_s6 = smov 8   ;;  %s19_s8 = sshll.u32 %s1228_s0, 4  ;;  %s20_s8 = int_to_ptr.hbm [resolvable:$true] %s19_s8 }
   0x9   :  { %61 = dma.hbm_to_vmem [thread:$0]  %s54_s25, 6144, %s56_s29, [#allocation9], %s1131_s30, %s1131_s30, %s1132_s6  }
   0xa   :  { %s1133_s9 = smov [#allocation2]   ;;  %s43_s12 = sshll.u32 %s1230_s2, 4  ;;  %s44_s12 = int_to_ptr.hbm [resolvable:$true] %s43_s12 }
   0xb   :  { %s21_s10 = sshll.u32 %s1133_s9, 4  ;;  %s1134_s13 = smov [#allocation7]   ;;  %s22_s10 = int_to_ptr.vmem [resolvable:$true] %s21_s10 }
   0xc   :  { %24 = dma.hbm_to_vmem [thread:$0]  %s20_s8, 896, %s22_s10, [#allocation3]  }
   0xd   :  { %s45_s14 = sshll.u32 %s1134_s13, 4  ;;  %s67_s17 = sshll.u32 %s1232_s4, 4  ;;  %s46_s14 = int_to_ptr.vmem [resolvable:$true] %s45_s14  ;;  %s68_s17 = int_to_ptr.hbm [resolvable:$true] %s67_s17 }
   0xe   :  { %48 = dma.hbm_to_vmem [thread:$0]  %s44_s12, 48, %s46_s14, [#allocation6]  }
   0xf   :  { %s1135_s0 = smov [#allocation10]  }
  0x10   :  { %s69_s18 = sshll.u32 %s1135_s0, 4  ;;  %s70_s18 = int_to_ptr.vmem [resolvable:$true] %s69_s18 }
  0x11   :  { %72 = dma.hbm_to_vmem [thread:$0]  %s68_s17, 16, %s70_s18, [#allocation9]  }
  0x12   :  { %1119 = dma.done.wait [#allocation3], 896  }
  0x13   :  { %1120 = vsyncadd [#allocation3], 4294966400 }
  0x14   :  { %1121 = dma.done.wait [#allocation6], 37680  }
  0x15   :  { %1122 = vsyncadd [#allocation6], 4294929616 }
  0x16   :  { %1123 = dma.done.wait [#allocation9], 6160  }
  0x17   :  { %1124 = vsyncadd [#allocation9], 4294961136  ;;  %v241_v0 = vld [vmem:[#allocation5 + $0x468] sm:$0xff]  ;;  %v238_v2 = vld [vmem:[#allocation5 + $0x450] sm:$0xff]  ;;  %vm402_vm0 = vcmask 130048   ;;  %s1136_s2 = smov [#allocation11]  }
  0x18   :  { %v289_v1 = vld [vmem:[#allocation5 + $0x5e8] sm:$0xff]  ;;  %446 = vmatpush.msra.mxu2 %v241_v0  ;;  %v286_v3 = vld [vmem:[#allocation5 + $0x5d0] sm:$0xff]  ;;  %v235_v6 = vld [vmem:[#allocation5 + $0x438] sm:$0xff]  ;;  %s947_s4 = sshll.u32 %s1136_s2, 4  ;;  %s949_s21 = sshll.u32 %s1233_s5, 4  ;;  %s948_s4 = int_to_ptr.vmem [resolvable:$true] %s947_s4  ;;  %s950_s21 = int_to_ptr.hbm [resolvable:$true] %s949_s21 }
  0x19   :  { %466 = vmatpush.msra.mxu3 %v289_v1  ;;  %v145_v4 = vld [vmem:[#allocation5 + $0x168] sm:$0xff]  ;;  %v283_v7 = vld [vmem:[#allocation5 + $0x5b8] sm:$0xff]  ;;  %v142_v8 = vld [vmem:[#allocation5 + $0x150] sm:$0xff] }
  0x1a   :  { %v193_v5 = vld [vmem:[#allocation5 + $0x2e8] sm:$0xff]  ;;  %406 = vmatpush.msra.mxu0 %v145_v4  ;;  %447 = vmatpush.msra.mxu2 %v238_v2  ;;  %v190_v9 = vld [vmem:[#allocation5 + $0x2d0] sm:$0xff]  ;;  %v232_v10 = vld [vmem:[#allocation5 + $0x420] sm:$0xff] }
  0x1b   :  { %426 = vmatpush.msra.mxu1 %v193_v5  ;;  %467 = vmatpush.msra.mxu3 %v286_v3  ;;  %v280_v11 = vld [vmem:[#allocation5 + $0x5a0] sm:$0xff]  ;;  %v139_v12 = vld [vmem:[#allocation5 + $0x138] sm:$0xff]  ;;  %v229_v16 = vld [vmem:[#allocation5 + $0x408] sm:$0xff] }
  0x1c   :  { %407 = vmatpush.msra.mxu0 %v142_v8  ;;  %v187_v13 = vld [vmem:[#allocation5 + $0x2b8] sm:$0xff]  ;;  %448 = vmatpush.msra.mxu2 %v235_v6  ;;  %v136_v14 = vld [vmem:[#allocation5 + $0x120] sm:$0xff]  ;;  %v277_v17 = vld [vmem:[#allocation5 + $0x588] sm:$0xff] }
  0x1d   :  { %427 = vmatpush.msra.mxu1 %v190_v9  ;;  %468 = vmatpush.msra.mxu3 %v283_v7  ;;  %v184_v15 = vld [vmem:[#allocation5 + $0x2a0] sm:$0xff]  ;;  %v133_v18 = vld [vmem:[#allocation5 + $0x108] sm:$0xff]  ;;  %v226_v20 = vld [vmem:[#allocation5 + $0x3f0] sm:$0xff] }
  0x1e   :  { %408 = vmatpush.msra.mxu0 %v139_v12  ;;  %449 = vmatpush.msra.mxu2 %v232_v10  ;;  %v181_v19 = vld [vmem:[#allocation5 + $0x288] sm:$0xff]  ;;  %v274_v21 = vld [vmem:[#allocation5 + $0x570] sm:$0xff]  ;;  %v223_v24 = vld [vmem:[#allocation5 + $0x3d8] sm:$0xff] }
  0x1f   :  { %428 = vmatpush.msra.mxu1 %v187_v13  ;;  %469 = vmatpush.msra.mxu3 %v280_v11  ;;  %v130_v22 = vld [vmem:[#allocation5 + $0xf0] sm:$0xff]  ;;  %v271_v25 = vld [vmem:[#allocation5 + $0x558] sm:$0xff]  ;;  %v220_v28 = vld [vmem:[#allocation5 + $0x3c0] sm:$0xff] }
  0x20   :  { %409 = vmatpush.msra.mxu0 %v136_v14  ;;  %450 = vmatpush.msra.mxu2 %v229_v16  ;;  %v178_v23 = vld [vmem:[#allocation5 + $0x270] sm:$0xff]  ;;  %v127_v26 = vld [vmem:[#allocation5 + $0xd8] sm:$0xff]  ;;  %v268_v29 = vld [vmem:[#allocation5 + $0x540] sm:$0xff] }
  0x21   :  { %429 = vmatpush.msra.mxu1 %v184_v15  ;;  %470 = vmatpush.msra.mxu3 %v277_v17  ;;  %v175_v27 = vld [vmem:[#allocation5 + $0x258] sm:$0xff]  ;;  %v124_v30 = vld [vmem:[#allocation5 + $0xc0] sm:$0xff]  ;;  %v217_v32 = vld [vmem:[#allocation5 + $0x3a8] sm:$0xff] }
  0x22   :  { %410 = vmatpush.msra.mxu0 %v133_v18  ;;  %451 = vmatpush.msra.mxu2 %v226_v20  ;;  %v172_v31 = vld [vmem:[#allocation5 + $0x240] sm:$0xff]  ;;  %v265_v33 = vld [vmem:[#allocation5 + $0x528] sm:$0xff]  ;;  %v214_v36 = vld [vmem:[#allocation5 + $0x390] sm:$0xff] }
  0x23   :  { %430 = vmatpush.msra.mxu1 %v181_v19  ;;  %471 = vmatpush.msra.mxu3 %v274_v21  ;;  %v121_v34 = vld [vmem:[#allocation5 + $0xa8] sm:$0xff]  ;;  %v262_v37 = vld [vmem:[#allocation5 + $0x510] sm:$0xff]  ;;  %v211_v40 = vld [vmem:[#allocation5 + $0x378] sm:$0xff] }
  0x24   :  { %411 = vmatpush.msra.mxu0 %v130_v22  ;;  %452 = vmatpush.msra.mxu2 %v223_v24  ;;  %v169_v35 = vld [vmem:[#allocation5 + $0x228] sm:$0xff]  ;;  %v118_v38 = vld [vmem:[#allocation5 + $0x90] sm:$0xff]  ;;  %v259_v41 = vld [vmem:[#allocation5 + $0x4f8] sm:$0xff] }
  0x25   :  { %431 = vmatpush.msra.mxu1 %v178_v23  ;;  %472 = vmatpush.msra.mxu3 %v271_v25  ;;  %v166_v39 = vld [vmem:[#allocation5 + $0x210] sm:$0xff]  ;;  %v115_v42 = vld [vmem:[#allocation5 + $0x78] sm:$0xff]  ;;  %v208_v44 = vld [vmem:[#allocation5 + $0x360] sm:$0xff] }
  0x26   :  { %412 = vmatpush.msra.mxu0 %v127_v26  ;;  %453 = vmatpush.msra.mxu2 %v220_v28  ;;  %v163_v43 = vld [vmem:[#allocation5 + $0x1f8] sm:$0xff]  ;;  %v256_v45 = vld [vmem:[#allocation5 + $0x4e0] sm:$0xff]  ;;  %v205_v48 = vld [vmem:[#allocation5 + $0x348] sm:$0xff] }
  0x27   :  { %432 = vmatpush.msra.mxu1 %v175_v27  ;;  %473 = vmatpush.msra.mxu3 %v268_v29  ;;  %v112_v46 = vld [vmem:[#allocation5 + $0x60] sm:$0xff]  ;;  %v253_v49 = vld [vmem:[#allocation5 + $0x4c8] sm:$0xff]  ;;  %v202_v52 = vld [vmem:[#allocation5 + $0x330] sm:$0xff] }
  0x28   :  { %413 = vmatpush.msra.mxu0 %v124_v30  ;;  %454 = vmatpush.msra.mxu2 %v217_v32  ;;  %v160_v47 = vld [vmem:[#allocation5 + $0x1e0] sm:$0xff]  ;;  %v109_v50 = vld [vmem:[#allocation5 + $0x48] sm:$0xff]  ;;  %v250_v53 = vld [vmem:[#allocation5 + $0x4b0] sm:$0xff] }
  0x29   :  { %433 = vmatpush.msra.mxu1 %v172_v31  ;;  %474 = vmatpush.msra.mxu3 %v265_v33  ;;  %v157_v51 = vld [vmem:[#allocation5 + $0x1c8] sm:$0xff]  ;;  %v106_v54 = vld [vmem:[#allocation5 + $0x30] sm:$0xff]  ;;  %v199_v56 = vld [vmem:[#allocation5 + $0x318] sm:$0xff] }
  0x2a   :  { %414 = vmatpush.msra.mxu0 %v121_v34  ;;  %455 = vmatpush.msra.mxu2 %v214_v36  ;;  %v154_v55 = vld [vmem:[#allocation5 + $0x1b0] sm:$0xff]  ;;  %v247_v57 = vld [vmem:[#allocation5 + $0x498] sm:$0xff]  ;;  %v196_v60 = vld [vmem:[#allocation5 + $0x300] sm:$0xff] }
  0x2b   :  { %434 = vmatpush.msra.mxu1 %v169_v35  ;;  %475 = vmatpush.msra.mxu3 %v262_v37  ;;  %v103_v58 = vld [vmem:[#allocation5 + $0x18] sm:$0xff]  ;;  %v244_v61 = vld [vmem:[#allocation5 + $0x480] sm:$0xff]  ;;  %v146_v63 = vld [vmem:[#allocation5 + $0x170] sm:$0xff] }
  0x2c   :  { %415 = vmatpush.msra.mxu0 %v118_v38  ;;  %456 = vmatpush.msra.mxu2 %v211_v40  ;;  %v151_v59 = vld [vmem:[#allocation5 + $0x198] sm:$0xff]  ;;  %v100_v0 = vld [vmem:[#allocation5] sm:$0xff]  ;;  %v337_v5 = vld [vmem:[#allocation5 + $0x768] sm:$0xff] }
  0x2d   :  { %435 = vmatpush.msra.mxu1 %v166_v39  ;;  %476 = vmatpush.msra.mxu3 %v259_v41  ;;  %v391_v62 = vld [vmem:[#allocation5 + $0x918] sm:$0xff]  ;;  %v148_v1 = vld [vmem:[#allocation5 + $0x180] sm:$0xff]  ;;  %v194_v6 = vld [vmem:[#allocation5 + $0x2f0] sm:$0xff] }
  0x2e   :  { %416 = vmatpush.msra.mxu0 %v115_v42  ;;  %457 = vmatpush.msra.mxu2 %v208_v44  ;;  %v388_v2 = vld [vmem:[#allocation5 + $0x900] sm:$0xff]  ;;  %v143_v3 = vld [vmem:[#allocation5 + $0x158] sm:$0xff]  ;;  %v385_v7 = vld [vmem:[#allocation5 + $0x8e8] sm:$0xff] }
  0x2f   :  { %436 = vmatpush.msra.mxu1 %v163_v43  ;;  %477 = vmatpush.msra.mxu3 %v256_v45  ;;  %v1182_v4 = vld [vmem:[#allocation2 + $0x10] sm:$0xff]  ;;  %v140_v8 = vld [vmem:[#allocation5 + $0x140] sm:$0xff]  ;;  %v334_v9 = vld [vmem:[#allocation5 + $0x750] sm:$0xff] }
  0x30   :  { %417 = vmatpush.msra.mxu0 %v112_v46  ;;  %458 = vmatpush.msra.mxu2 %v205_v48  ;;  %v191_v10 = vld [vmem:[#allocation5 + $0x2d8] sm:$0xff]  ;;  %v382_v11 = vld [vmem:[#allocation5 + $0x8d0] sm:$0xff]  ;;  %v137_v12 = vld [vmem:[#allocation5 + $0x128] sm:$0xff] }
  0x31   :  { %437 = vmatpush.msra.mxu1 %v160_v47  ;;  %478 = vmatpush.msra.mxu3 %v253_v49  ;;  %v331_v13 = vld [vmem:[#allocation5 + $0x738] sm:$0xff]  ;;  %v188_v14 = vld [vmem:[#allocation5 + $0x2c0] sm:$0xff]  ;;  %v134_v16 = vld [vmem:[#allocation5 + $0x110] sm:$0xff] }
  0x32   :  { %418 = vmatpush.msra.mxu0 %v109_v50  ;;  %459 = vmatpush.msra.mxu2 %v202_v52  ;;  %v379_v15 = vld [vmem:[#allocation5 + $0x8b8] sm:$0xff]  ;;  %v328_v17 = vld [vmem:[#allocation5 + $0x720] sm:$0xff]  ;;  %v185_v18 = vld [vmem:[#allocation5 + $0x2a8] sm:$0xff] }
  0x33   :  { %438 = vmatpush.msra.mxu1 %v157_v51  ;;  %479 = vmatpush.msra.mxu3 %v250_v53  ;;  %v376_v19 = vld [vmem:[#allocation5 + $0x8a0] sm:$0xff]  ;;  %v131_v20 = vld [vmem:[#allocation5 + $0xf8] sm:$0xff]  ;;  %v325_v21 = vld [vmem:[#allocation5 + $0x708] sm:$0xff] }
  0x34   :  { %419 = vmatpush.msra.mxu0 %v106_v54  ;;  %460 = vmatpush.msra.mxu2 %v199_v56  ;;  %v182_v22 = vld [vmem:[#allocation5 + $0x290] sm:$0xff]  ;;  %v373_v23 = vld [vmem:[#allocation5 + $0x888] sm:$0xff]  ;;  %v128_v24 = vld [vmem:[#allocation5 + $0xe0] sm:$0xff] }
  0x35   :  { %439 = vmatpush.msra.mxu1 %v154_v55  ;;  %480 = vmatpush.msra.mxu3 %v247_v57  ;;  %v322_v25 = vld [vmem:[#allocation5 + $0x6f0] sm:$0xff]  ;;  %v179_v26 = vld [vmem:[#allocation5 + $0x278] sm:$0xff]  ;;  %v125_v28 = vld [vmem:[#allocation5 + $0xc8] sm:$0xff] }
  0x36   :  { %420 = vmatpush.msra.mxu0 %v103_v58  ;;  %461 = vmatpush.msra.mxu2 %v196_v60  ;;  %v370_v27 = vld [vmem:[#allocation5 + $0x870] sm:$0xff]  ;;  %v319_v29 = vld [vmem:[#allocation5 + $0x6d8] sm:$0xff]  ;;  %v176_v30 = vld [vmem:[#allocation5 + $0x260] sm:$0xff] }
  0x37   :  { %440 = vmatpush.msra.mxu1 %v151_v59  ;;  %481 = vmatpush.msra.mxu3 %v244_v61  ;;  %v367_v31 = vld [vmem:[#allocation5 + $0x858] sm:$0xff]  ;;  %v122_v32 = vld [vmem:[#allocation5 + $0xb0] sm:$0xff]  ;;  %v316_v33 = vld [vmem:[#allocation5 + $0x6c0] sm:$0xff] }
  0x38   :  { %540 = vmatpush.msrb.mxu2 %v391_v62  ;;  %421 = vmatpush.msra.mxu0 %v100_v0  ;;  %v173_v34 = vld [vmem:[#allocation5 + $0x248] sm:$0xff]  ;;  %v364_v35 = vld [vmem:[#allocation5 + $0x840] sm:$0xff]  ;;  %v119_v36 = vld [vmem:[#allocation5 + $0x98] sm:$0xff] }
  0x39   :  { %546 = vmatpush.msrb.mxu3 %v146_v63  ;;  %441 = vmatpush.msra.mxu1 %v148_v1  ;;  %v313_v37 = vld [vmem:[#allocation5 + $0x6a8] sm:$0xff]  ;;  %v170_v38 = vld [vmem:[#allocation5 + $0x230] sm:$0xff]  ;;  %v116_v40 = vld [vmem:[#allocation5 + $0x80] sm:$0xff] }
  0x3a   :  { %541 = vmatpush.msrb.mxu2 %v388_v2  ;;  %486 = vmatpush.msrb.mxu0 %v337_v5  ;;  %v361_v39 = vld [vmem:[#allocation5 + $0x828] sm:$0xff]  ;;  %v310_v41 = vld [vmem:[#allocation5 + $0x690] sm:$0xff]  ;;  %v167_v42 = vld [vmem:[#allocation5 + $0x218] sm:$0xff] }
  0x3b   :  { %547 = vmatpush.msrb.mxu3 %v143_v3  ;;  %462 = vmatmul.f32.vlgmr.msra.gmra.mxu2 %v1182_v4  ;;  %v358_v43 = vld [vmem:[#allocation5 + $0x810] sm:$0xff]  ;;  %v113_v44 = vld [vmem:[#allocation5 + $0x68] sm:$0xff]  ;;  %v307_v45 = vld [vmem:[#allocation5 + $0x678] sm:$0xff] }
  0x3c   :  { %566 = vmatpush.msra.mxu2 %v194_v6  ;;  %506 = vmatpush.msrb.mxu1 %v385_v7  ;;  %v164_v46 = vld [vmem:[#allocation5 + $0x200] sm:$0xff]  ;;  %v355_v47 = vld [vmem:[#allocation5 + $0x7f8] sm:$0xff]  ;;  %v110_v48 = vld [vmem:[#allocation5 + $0x50] sm:$0xff] }
  0x3d   :  { %548 = vmatpush.msrb.mxu3 %v140_v8  ;;  %487 = vmatpush.msrb.mxu0 %v334_v9  ;;  %v304_v49 = vld [vmem:[#allocation5 + $0x660] sm:$0xff]  ;;  %v161_v50 = vld [vmem:[#allocation5 + $0x1e8] sm:$0xff]  ;;  %v107_v52 = vld [vmem:[#allocation5 + $0x38] sm:$0xff] }
  0x3e   :  { %567 = vmatpush.msra.mxu2 %v191_v10  ;;  %507 = vmatpush.msrb.mxu1 %v382_v11  ;;  %v352_v51 = vld [vmem:[#allocation5 + $0x7e0] sm:$0xff]  ;;  %v301_v53 = vld [vmem:[#allocation5 + $0x648] sm:$0xff]  ;;  %v158_v54 = vld [vmem:[#allocation5 + $0x1d0] sm:$0xff] }
  0x3f   :  { %549 = vmatpush.msrb.mxu3 %v137_v12  ;;  %488 = vmatpush.msrb.mxu0 %v331_v13  ;;  %v349_v55 = vld [vmem:[#allocation5 + $0x7c8] sm:$0xff]  ;;  %v104_v56 = vld [vmem:[#allocation5 + $0x20] sm:$0xff]  ;;  %v298_v59 = vld [vmem:[#allocation5 + $0x630] sm:$0xff] }
  0x40   :  { %568 = vmatpush.msra.mxu2 %v188_v14  ;;  %508 = vmatpush.msrb.mxu1 %v379_v15  ;;  %v1185_v57 = vld [vmem:[#allocation2] sm:$0xff]  ;;  %v1187_v58 = vld [vmem:[#allocation2 + $0x18] sm:$0xff]  ;;  %v155_v60 = vld [vmem:[#allocation5 + $0x1b8] sm:$0xff] }
  0x41   :  { %550 = vmatpush.msrb.mxu3 %v134_v16  ;;  %489 = vmatpush.msrb.mxu0 %v328_v17  ;;  %v346_v61 = vld [vmem:[#allocation5 + $0x7b0] sm:$0xff]  ;;  %v101_v62 = vld [vmem:[#allocation5 + $0x8] sm:$0xff]  ;;  %v295_v0 = vld [vmem:[#allocation5 + $0x618] sm:$0xff] }
  0x42   :  { %569 = vmatpush.msra.mxu2 %v185_v18  ;;  %509 = vmatpush.msrb.mxu1 %v376_v19  ;;  %v1190_v63 = vld [vmem:[#allocation2 + $0x8] sm:$0xff]  ;;  %v152_v1 = vld [vmem:[#allocation5 + $0x1a0] sm:$0xff]  ;;  %v343_v3 = vld [vmem:[#allocation5 + $0x798] sm:$0xff] }
  0x43   :  { %551 = vmatpush.msrb.mxu3 %v131_v20  ;;  %490 = vmatpush.msrb.mxu0 %v325_v21  ;;  %v338_v2 = vld [vmem:[#allocation5 + $0x770] sm:$0xff]  ;;  %v292_v5 = vld [vmem:[#allocation5 + $0x600] sm:$0xff]  ;;  %v149_v6 = vld [vmem:[#allocation5 + $0x188] sm:$0xff] }
  0x44   :  { %570 = vmatpush.msra.mxu2 %v182_v22  ;;  %510 = vmatpush.msrb.mxu1 %v373_v23  ;;  %v335_v7 = vld [vmem:[#allocation5 + $0x758] sm:$0xff]  ;;  %v340_v8 = vld [vmem:[#allocation5 + $0x780] sm:$0xff]  ;;  %v242_v10 = vld [vmem:[#allocation5 + $0x470] sm:$0xff] }
  0x45   :  { %552 = vmatpush.msrb.mxu3 %v128_v24  ;;  %491 = vmatpush.msrb.mxu0 %v322_v25  ;;  %v1194_v9 = vld [vmem:[#allocation2 + $0x30] sm:$0xff]  ;;  %v386_v11 = vld [vmem:[#allocation5 + $0x8f0] sm:$0xff]  ;;  %v332_v13 = vld [vmem:[#allocation5 + $0x740] sm:$0xff] }
  0x46   :  { %571 = vmatpush.msra.mxu2 %v179_v26  ;;  %511 = vmatpush.msrb.mxu1 %v370_v27  ;;  %v290_v12 = vld [vmem:[#allocation5 + $0x5f0] sm:$0xff]  ;;  %v239_v14 = vld [vmem:[#allocation5 + $0x458] sm:$0xff]  ;;  %v1198_v16 = vld [vmem:[#allocation2 + $0x20] sm:$0xff] }
  0x47   :  { %553 = vmatpush.msrb.mxu3 %v125_v28  ;;  %492 = vmatpush.msrb.mxu0 %v319_v29  ;;  %v383_v15 = vld [vmem:[#allocation5 + $0x8d8] sm:$0xff]  ;;  %v329_v18 = vld [vmem:[#allocation5 + $0x728] sm:$0xff]  ;;  %v236_v19 = vld [vmem:[#allocation5 + $0x440] sm:$0xff] }
  0x48   :  { %572 = vmatpush.msra.mxu2 %v176_v30  ;;  %512 = vmatpush.msrb.mxu1 %v367_v31  ;;  %v287_v17 = vld [vmem:[#allocation5 + $0x5d8] sm:$0xff]  ;;  %v380_v20 = vld [vmem:[#allocation5 + $0x8c0] sm:$0xff]  ;;  %v1201_v21 = vld [vmem:[#allocation2 + $0x28] sm:$0xff] }
  0x49   :  { %554 = vmatpush.msrb.mxu3 %v122_v32  ;;  %493 = vmatpush.msrb.mxu0 %v316_v33  ;;  %v326_v22 = vld [vmem:[#allocation5 + $0x710] sm:$0xff]  ;;  %v284_v23 = vld [vmem:[#allocation5 + $0x5c0] sm:$0xff]  ;;  %v233_v24 = vld [vmem:[#allocation5 + $0x428] sm:$0xff] }
  0x4a   :  { %573 = vmatpush.msra.mxu2 %v173_v34  ;;  %513 = vmatpush.msrb.mxu1 %v364_v35  ;;  %v377_v25 = vld [vmem:[#allocation5 + $0x8a8] sm:$0xff]  ;;  %v323_v26 = vld [vmem:[#allocation5 + $0x6f8] sm:$0xff]  ;;  %v230_v28 = vld [vmem:[#allocation5 + $0x410] sm:$0xff] }
  0x4b   :  { %555 = vmatpush.msrb.mxu3 %v119_v36  ;;  %494 = vmatpush.msrb.mxu0 %v313_v37  ;;  %v281_v27 = vld [vmem:[#allocation5 + $0x5a8] sm:$0xff]  ;;  %v374_v29 = vld [vmem:[#allocation5 + $0x890] sm:$0xff]  ;;  %v320_v30 = vld [vmem:[#allocation5 + $0x6e0] sm:$0xff] }
  0x4c   :  { %574 = vmatpush.msra.mxu2 %v170_v38  ;;  %514 = vmatpush.msrb.mxu1 %v361_v39  ;;  %v278_v31 = vld [vmem:[#allocation5 + $0x590] sm:$0xff]  ;;  %v227_v32 = vld [vmem:[#allocation5 + $0x3f8] sm:$0xff]  ;;  %v317_v34 = vld [vmem:[#allocation5 + $0x6c8] sm:$0xff] }
  0x4d   :  { %556 = vmatpush.msrb.mxu3 %v116_v40  ;;  %495 = vmatpush.msrb.mxu0 %v310_v41  ;;  %v371_v33 = vld [vmem:[#allocation5 + $0x878] sm:$0xff]  ;;  %v224_v36 = vld [vmem:[#allocation5 + $0x3e0] sm:$0xff]  ;;  %v314_v38 = vld [vmem:[#allocation5 + $0x6b0] sm:$0xff] }
  0x4e   :  { %575 = vmatpush.msra.mxu2 %v167_v42  ;;  %515 = vmatpush.msrb.mxu1 %v358_v43  ;;  %v275_v35 = vld [vmem:[#allocation5 + $0x578] sm:$0xff]  ;;  %v368_v37 = vld [vmem:[#allocation5 + $0x860] sm:$0xff]  ;;  %v221_v40 = vld [vmem:[#allocation5 + $0x3c8] sm:$0xff] }
  0x4f   :  { %557 = vmatpush.msrb.mxu3 %v113_v44  ;;  %496 = vmatpush.msrb.mxu0 %v307_v45  ;;  %v272_v39 = vld [vmem:[#allocation5 + $0x560] sm:$0xff]  ;;  %v365_v41 = vld [vmem:[#allocation5 + $0x848] sm:$0xff]  ;;  %v311_v42 = vld [vmem:[#allocation5 + $0x698] sm:$0xff] }
  0x50   :  { %576 = vmatpush.msra.mxu2 %v164_v46  ;;  %516 = vmatpush.msrb.mxu1 %v355_v47  ;;  %v269_v43 = vld [vmem:[#allocation5 + $0x548] sm:$0xff]  ;;  %v218_v44 = vld [vmem:[#allocation5 + $0x3b0] sm:$0xff]  ;;  %v308_v46 = vld [vmem:[#allocation5 + $0x680] sm:$0xff] }
  0x51   :  { %558 = vmatpush.msrb.mxu3 %v110_v48  ;;  %497 = vmatpush.msrb.mxu0 %v304_v49  ;;  %v362_v45 = vld [vmem:[#allocation5 + $0x830] sm:$0xff]  ;;  %v215_v48 = vld [vmem:[#allocation5 + $0x398] sm:$0xff] }
  0x52   :  { %577 = vmatpush.msra.mxu2 %v161_v50  ;;  %517 = vmatpush.msrb.mxu1 %v352_v51  ;;  %v266_v47 = vld [vmem:[#allocation5 + $0x530] sm:$0xff]  ;;  %v359_v49 = vld [vmem:[#allocation5 + $0x818] sm:$0xff]  ;;  %v305_v50 = vld [vmem:[#allocation5 + $0x668] sm:$0xff] }
  0x53   :  { %559 = vmatpush.msrb.mxu3 %v107_v52  ;;  %498 = vmatpush.msrb.mxu0 %v301_v53  ;;  %v263_v51 = vld [vmem:[#allocation5 + $0x518] sm:$0xff]  ;;  %v212_v52 = vld [vmem:[#allocation5 + $0x380] sm:$0xff] }
  0x54   :  { %578 = vmatpush.msra.mxu2 %v158_v54  ;;  %518 = vmatpush.msrb.mxu1 %v349_v55  ;;  %v356_v53 = vld [vmem:[#allocation5 + $0x800] sm:$0xff]  ;;  %v302_v55 = vld [vmem:[#allocation5 + $0x650] sm:$0xff] }
  0x55   :  { %560 = vmatpush.msrb.mxu3 %v104_v56  ;;  %422 = vmatmul.f32.vlgmr.msra.gmra.mxu0 %v1185_v57  ;;  %v260_v54 = vld [vmem:[#allocation5 + $0x500] sm:$0xff]  ;;  %v209_v56 = vld [vmem:[#allocation5 + $0x368] sm:$0xff] }
  0x56   :  { %482 = vmatmul.f32.vlgmr.msra.gmra.mxu3 %v1187_v58  ;;  %499 = vmatpush.msrb.mxu0 %v298_v59  ;;  %v353_v59 = vld [vmem:[#allocation5 + $0x7e8] sm:$0xff] }
  0x57   :  { %579 = vmatpush.msra.mxu2 %v155_v60  ;;  %519 = vmatpush.msrb.mxu1 %v346_v61  ;;  %v257_v60 = vld [vmem:[#allocation5 + $0x4e8] sm:$0xff]  ;;  %v299_v61 = vld [vmem:[#allocation5 + $0x638] sm:$0xff] }
  0x58   :  { %561 = vmatpush.msrb.mxu3 %v101_v62  ;;  %442 = vmatmul.f32.vlgmr.msra.gmra.mxu1 %v1190_v63  ;;  %v206_v62 = vld [vmem:[#allocation5 + $0x350] sm:$0xff] }
  0x59   :  { %500 = vmatpush.msrb.mxu0 %v295_v0  ;;  %580 = vmatpush.msra.mxu2 %v152_v1  ;;  %v350_v0 = vld [vmem:[#allocation5 + $0x7d0] sm:$0xff] }
  0x5a   :  { %626 = vmatpush.msra.mxu3 %v338_v2  ;;  %520 = vmatpush.msrb.mxu1 %v343_v3  ;;  %v254_v1 = vld [vmem:[#allocation5 + $0x4d0] sm:$0xff]  ;;  %v296_v2 = vld [vmem:[#allocation5 + $0x620] sm:$0xff]  ;;  %v203_v3 = vld [vmem:[#allocation5 + $0x338] sm:$0xff] }
  0x5b   :  { %501 = vmatpush.msrb.mxu0 %v292_v5  ;;  %581 = vmatpush.msra.mxu2 %v149_v6  ;;  %v347_v5 = vld [vmem:[#allocation5 + $0x7b8] sm:$0xff] }
  0x5c   :  { %627 = vmatpush.msra.mxu3 %v335_v7  ;;  %521 = vmatpush.msrb.mxu1 %v340_v8  ;;  %v251_v6 = vld [vmem:[#allocation5 + $0x4b8] sm:$0xff]  ;;  %v293_v7 = vld [vmem:[#allocation5 + $0x608] sm:$0xff]  ;;  %v200_v8 = vld [vmem:[#allocation5 + $0x320] sm:$0xff] }
  0x5d   :  { %961 = vmatmul.msk.f32.vlgmr.msrb.gmra.mxu2 %vm402_vm0, %v1194_v9  ;;  %586 = vmatpush.msra.mxu0 %v242_v10  ;;  %v344_v10 = vld [vmem:[#allocation5 + $0x7a0] sm:$0xff] }
  0x5e   :  { %646 = vmatpush.msrb.mxu2 %v386_v11  ;;  %606 = vmatpush.msra.mxu1 %v290_v12  ;;  %v195_v11 = vld [vmem:[#allocation5 + $0x2f8] sm:$0xff]  ;;  %v248_v12 = vld [vmem:[#allocation5 + $0x4a0] sm:$0xff] }
  0x5f   :  { %628 = vmatpush.msra.mxu3 %v332_v13  ;;  %587 = vmatpush.msra.mxu0 %v239_v14  ;;  %v197_v13 = vld [vmem:[#allocation5 + $0x308] sm:$0xff] }
  0x60   :  { %647 = vmatpush.msrb.mxu2 %v383_v15  ;;  %502 = vmatmul.f32.vlgmr.msrb.gmra.mxu0 %v1198_v16  ;;  %v341_v14 = vld [vmem:[#allocation5 + $0x788] sm:$0xff]  ;;  %v192_v15 = vld [vmem:[#allocation5 + $0x2e0] sm:$0xff] }
  0x61   :  { %607 = vmatpush.msra.mxu1 %v287_v17  ;;  %629 = vmatpush.msra.mxu3 %v329_v18  ;;  %v245_v17 = vld [vmem:[#allocation5 + $0x488] sm:$0xff]  ;;  %v147_v18 = vld [vmem:[#allocation5 + $0x178] sm:$0xff] }
  0x62   :  { %588 = vmatpush.msra.mxu0 %v236_v19  ;;  %648 = vmatpush.msrb.mxu2 %v380_v20  ;;  %v189_v19 = vld [vmem:[#allocation5 + $0x2c8] sm:$0xff]  ;;  %v392_v20 = vld [vmem:[#allocation5 + $0x920] sm:$0xff] }
  0x63   :  { %522 = vmatmul.f32.vlgmr.msrb.gmra.mxu1 %v1201_v21  ;;  %630 = vmatpush.msra.mxu3 %v326_v22  ;;  %v144_v22 = vld [vmem:[#allocation5 + $0x160] sm:$0xff] }
  0x64   :  { %608 = vmatpush.msra.mxu1 %v284_v23  ;;  %589 = vmatpush.msra.mxu0 %v233_v24  ;;  %v186_v23 = vld [vmem:[#allocation5 + $0x2b0] sm:$0xff]  ;;  %v389_v24 = vld [vmem:[#allocation5 + $0x908] sm:$0xff] }
  0x65   :  { %649 = vmatpush.msrb.mxu2 %v377_v25  ;;  %631 = vmatpush.msra.mxu3 %v323_v26  ;;  %v291_v25 = vld [vmem:[#allocation5 + $0x5f8] sm:$0xff]  ;;  %v141_v26 = vld [vmem:[#allocation5 + $0x148] sm:$0xff] }
  0x66   :  { %609 = vmatpush.msra.mxu1 %v281_v27  ;;  %590 = vmatpush.msra.mxu0 %v230_v28  ;;  %v183_v27 = vld [vmem:[#allocation5 + $0x298] sm:$0xff]  ;;  %v288_v28 = vld [vmem:[#allocation5 + $0x5e0] sm:$0xff] }
  0x67   :  { %650 = vmatpush.msrb.mxu2 %v374_v29  ;;  %632 = vmatpush.msra.mxu3 %v320_v30  ;;  %v243_v29 = vld [vmem:[#allocation5 + $0x478] sm:$0xff]  ;;  %v138_v30 = vld [vmem:[#allocation5 + $0x130] sm:$0xff] }
  0x68   :  { %610 = vmatpush.msra.mxu1 %v278_v31  ;;  %591 = vmatpush.msra.mxu0 %v227_v32  ;;  %v180_v31 = vld [vmem:[#allocation5 + $0x280] sm:$0xff]  ;;  %v285_v32 = vld [vmem:[#allocation5 + $0x5c8] sm:$0xff] }
  0x69   :  { %651 = vmatpush.msrb.mxu2 %v371_v33  ;;  %633 = vmatpush.msra.mxu3 %v317_v34  ;;  %v135_v33 = vld [vmem:[#allocation5 + $0x118] sm:$0xff]  ;;  %v177_v34 = vld [vmem:[#allocation5 + $0x268] sm:$0xff] }
  0x6a   :  { %611 = vmatpush.msra.mxu1 %v275_v35  ;;  %592 = vmatpush.msra.mxu0 %v224_v36  ;;  %v240_v35 = vld [vmem:[#allocation5 + $0x460] sm:$0xff]  ;;  %v282_v36 = vld [vmem:[#allocation5 + $0x5b0] sm:$0xff] }
  0x6b   :  { %652 = vmatpush.msrb.mxu2 %v368_v37  ;;  %634 = vmatpush.msra.mxu3 %v314_v38  ;;  %v132_v37 = vld [vmem:[#allocation5 + $0x100] sm:$0xff]  ;;  %v174_v38 = vld [vmem:[#allocation5 + $0x250] sm:$0xff] }
  0x6c   :  { %612 = vmatpush.msra.mxu1 %v272_v39  ;;  %593 = vmatpush.msra.mxu0 %v221_v40  ;;  %v237_v39 = vld [vmem:[#allocation5 + $0x448] sm:$0xff]  ;;  %v279_v40 = vld [vmem:[#allocation5 + $0x598] sm:$0xff] }
  0x6d   :  { %653 = vmatpush.msrb.mxu2 %v365_v41  ;;  %635 = vmatpush.msra.mxu3 %v311_v42  ;;  %v129_v41 = vld [vmem:[#allocation5 + $0xe8] sm:$0xff]  ;;  %v171_v42 = vld [vmem:[#allocation5 + $0x238] sm:$0xff] }
  0x6e   :  { %613 = vmatpush.msra.mxu1 %v269_v43  ;;  %594 = vmatpush.msra.mxu0 %v218_v44  ;;  %v234_v43 = vld [vmem:[#allocation5 + $0x430] sm:$0xff]  ;;  %v276_v44 = vld [vmem:[#allocation5 + $0x580] sm:$0xff] }
  0x6f   :  { %654 = vmatpush.msrb.mxu2 %v362_v45  ;;  %636 = vmatpush.msra.mxu3 %v308_v46  ;;  %v126_v45 = vld [vmem:[#allocation5 + $0xd0] sm:$0xff]  ;;  %v168_v46 = vld [vmem:[#allocation5 + $0x220] sm:$0xff] }
  0x70   :  { %614 = vmatpush.msra.mxu1 %v266_v47  ;;  %595 = vmatpush.msra.mxu0 %v215_v48  ;;  %v231_v47 = vld [vmem:[#allocation5 + $0x418] sm:$0xff]  ;;  %v273_v48 = vld [vmem:[#allocation5 + $0x568] sm:$0xff] }
  0x71   :  { %655 = vmatpush.msrb.mxu2 %v359_v49  ;;  %637 = vmatpush.msra.mxu3 %v305_v50  ;;  %v123_v49 = vld [vmem:[#allocation5 + $0xb8] sm:$0xff]  ;;  %v165_v50 = vld [vmem:[#allocation5 + $0x208] sm:$0xff] }
  0x72   :  { %615 = vmatpush.msra.mxu1 %v263_v51  ;;  %596 = vmatpush.msra.mxu0 %v212_v52  ;;  %v228_v51 = vld [vmem:[#allocation5 + $0x400] sm:$0xff]  ;;  %v270_v52 = vld [vmem:[#allocation5 + $0x550] sm:$0xff] }
  0x73   :  { %656 = vmatpush.msrb.mxu2 %v356_v53  ;;  %562 = vmatmul.f32.vlgmr.msrb.gmra.mxu3 %v1185_v57  ;;  %v120_v53 = vld [vmem:[#allocation5 + $0xa0] sm:$0xff] }
  0x74   :  { %616 = vmatpush.msra.mxu1 %v260_v54  ;;  %638 = vmatpush.msra.mxu3 %v302_v55  ;;  %v162_v54 = vld [vmem:[#allocation5 + $0x1f0] sm:$0xff]  ;;  %v225_v55 = vld [vmem:[#allocation5 + $0x3e8] sm:$0xff] }
  0x75   :  { %597 = vmatpush.msra.mxu0 %v209_v56  ;;  %657 = vmatpush.msrb.mxu2 %v353_v59  ;;  %v267_v56 = vld [vmem:[#allocation5 + $0x538] sm:$0xff]  ;;  %v117_v59 = vld [vmem:[#allocation5 + $0x88] sm:$0xff] }
  0x76   :  { %582 = vmatmul.f32.vlgmr.msra.gmra.mxu2 %v1190_v63  ;;  %617 = vmatpush.msra.mxu1 %v257_v60  ;;  %v159_v60 = vld [vmem:[#allocation5 + $0x1d8] sm:$0xff] }
  0x77   :  { %639 = vmatpush.msra.mxu3 %v299_v61  ;;  %598 = vmatpush.msra.mxu0 %v206_v62  ;;  %v222_v61 = vld [vmem:[#allocation5 + $0x3d0] sm:$0xff]  ;;  %v264_v62 = vld [vmem:[#allocation5 + $0x520] sm:$0xff] }
  0x78   :  { %658 = vmatpush.msrb.mxu2 %v350_v0  ;;  %618 = vmatpush.msra.mxu1 %v254_v1  ;;  %v114_v0 = vld [vmem:[#allocation5 + $0x70] sm:$0xff]  ;;  %v156_v1 = vld [vmem:[#allocation5 + $0x1c0] sm:$0xff] }
  0x79   :  { %640 = vmatpush.msra.mxu3 %v296_v2  ;;  %599 = vmatpush.msra.mxu0 %v203_v3  ;;  %v219_v2 = vld [vmem:[#allocation5 + $0x3b8] sm:$0xff]  ;;  %v261_v3 = vld [vmem:[#allocation5 + $0x508] sm:$0xff] }
  0x7a   :  { %659 = vmatpush.msrb.mxu2 %v347_v5  ;;  %619 = vmatpush.msra.mxu1 %v251_v6  ;;  %v111_v5 = vld [vmem:[#allocation5 + $0x58] sm:$0xff]  ;;  %v153_v6 = vld [vmem:[#allocation5 + $0x1a8] sm:$0xff] }
  0x7b   :  { %641 = vmatpush.msra.mxu3 %v293_v7  ;;  %600 = vmatpush.msra.mxu0 %v200_v8  ;;  %v216_v7 = vld [vmem:[#allocation5 + $0x3a0] sm:$0xff]  ;;  %v258_v8 = vld [vmem:[#allocation5 + $0x4f0] sm:$0xff] }
  0x7c   :  { %660 = vmatpush.msrb.mxu2 %v344_v10  ;;  %620 = vmatpush.msra.mxu1 %v248_v12  ;;  %v108_v10 = vld [vmem:[#allocation5 + $0x40] sm:$0xff]  ;;  %v387_v12 = vld [vmem:[#allocation5 + $0x8f8] sm:$0xff] }
  0x7d   :  { %706 = vmatpush.msrb.mxu3 %v195_v11  ;;  %601 = vmatpush.msra.mxu0 %v197_v13  ;;  %v150_v11 = vld [vmem:[#allocation5 + $0x190] sm:$0xff]  ;;  %v213_v13 = vld [vmem:[#allocation5 + $0x388] sm:$0xff] }
  0x7e   :  { %642 = vmatmul.f32.vlgmr.msra.gmra.mxu3 %v1198_v16  ;;  %661 = vmatpush.msrb.mxu2 %v341_v14  ;;  %v105_v14 = vld [vmem:[#allocation5 + $0x28] sm:$0xff] }
  0x7f   :  { %707 = vmatpush.msrb.mxu3 %v192_v15  ;;  %602 = vmatmul.f32.vlgmr.msra.gmra.mxu0 %v1182_v4  ;;  %v255_v15 = vld [vmem:[#allocation5 + $0x4d8] sm:$0xff] }
  0x80   :  { %621 = vmatpush.msra.mxu1 %v245_v17  ;;  %662 = vmatmul.f32.vlgmr.msrb.gmra.mxu2 %v1201_v21  ;;  %v384_v17 = vld [vmem:[#allocation5 + $0x8e0] sm:$0xff] }
  0x81   :  { %708 = vmatpush.msrb.mxu3 %v189_v19  ;;  %622 = vmatmul.f32.vlgmr.msra.gmra.mxu1 %v1187_v58  ;;  %v102_v19 = vld [vmem:[#allocation5 + $0x10] sm:$0xff] }
  0x82   :  { %686 = vmatpush.msrb.mxu1 %v147_v18  ;;  %680 = vmatpush.msrb.mxu0 %v392_v20  ;;  %v210_v18 = vld [vmem:[#allocation5 + $0x370] sm:$0xff]  ;;  %v252_v20 = vld [vmem:[#allocation5 + $0x4c0] sm:$0xff] }
  0x83   :  { %709 = vmatpush.msrb.mxu3 %v186_v23  ;;  %746 = vmatpush.msra.mxu2 %v291_v25  ;;  %v381_v23 = vld [vmem:[#allocation5 + $0x8c8] sm:$0xff]  ;;  %v336_v25 = vld [vmem:[#allocation5 + $0x760] sm:$0xff] }
  0x84   :  { %687 = vmatpush.msrb.mxu1 %v144_v22  ;;  %681 = vmatpush.msrb.mxu0 %v389_v24  ;;  %v339_v22 = vld [vmem:[#allocation5 + $0x778] sm:$0xff] }
  0x85   :  { %710 = vmatpush.msrb.mxu3 %v183_v27  ;;  %747 = vmatpush.msra.mxu2 %v288_v28  ;;  %v207_v24 = vld [vmem:[#allocation5 + $0x358] sm:$0xff]  ;;  %v249_v27 = vld [vmem:[#allocation5 + $0x4a8] sm:$0xff]  ;;  %v204_v28 = vld [vmem:[#allocation5 + $0x340] sm:$0xff] }
  0x86   :  { %688 = vmatpush.msrb.mxu1 %v141_v26  ;;  %726 = vmatpush.msra.mxu0 %v243_v29  ;;  %v378_v26 = vld [vmem:[#allocation5 + $0x8b0] sm:$0xff]  ;;  %v333_v29 = vld [vmem:[#allocation5 + $0x748] sm:$0xff] }
  0x87   :  { %711 = vmatpush.msrb.mxu3 %v180_v31  ;;  %962 = vmatmul.msk.f32.vlgmr.msrb.gmra.mxu0 %vm402_vm0, %v1194_v9  ;;  %v246_v31 = vld [vmem:[#allocation5 + $0x490] sm:$0xff] }
  0x88   :  { %689 = vmatpush.msrb.mxu1 %v138_v30  ;;  %748 = vmatpush.msra.mxu2 %v285_v32  ;;  %v375_v30 = vld [vmem:[#allocation5 + $0x898] sm:$0xff]  ;;  %v330_v32 = vld [vmem:[#allocation5 + $0x730] sm:$0xff] }
  0x89   :  { %712 = vmatpush.msrb.mxu3 %v177_v34  ;;  %727 = vmatpush.msra.mxu0 %v240_v35  ;;  %v201_v34 = vld [vmem:[#allocation5 + $0x328] sm:$0xff]  ;;  %v327_v35 = vld [vmem:[#allocation5 + $0x718] sm:$0xff] }
  0x8a   :  { %690 = vmatpush.msrb.mxu1 %v135_v33  ;;  %749 = vmatpush.msra.mxu2 %v282_v36  ;;  %v372_v33 = vld [vmem:[#allocation5 + $0x880] sm:$0xff]  ;;  %v369_v36 = vld [vmem:[#allocation5 + $0x868] sm:$0xff] }
  0x8b   :  { %713 = vmatpush.msrb.mxu3 %v174_v38  ;;  %728 = vmatpush.msra.mxu0 %v237_v39  ;;  %v324_v38 = vld [vmem:[#allocation5 + $0x700] sm:$0xff]  ;;  %v366_v39 = vld [vmem:[#allocation5 + $0x850] sm:$0xff] }
  0x8c   :  { %691 = vmatpush.msrb.mxu1 %v132_v37  ;;  %750 = vmatpush.msra.mxu2 %v279_v40  ;;  %v198_v37 = vld [vmem:[#allocation5 + $0x310] sm:$0xff]  ;;  %v843_v40 = vld [vmem:[#allocation8 + $0x70] sm:$0xff] }
  0x8d   :  { %714 = vmatpush.msrb.mxu3 %v171_v42  ;;  %729 = vmatpush.msra.mxu0 %v234_v43  ;;  %v363_v42 = vld [vmem:[#allocation5 + $0x838] sm:$0xff]  ;;  %v393_v43 = vld [vmem:[#allocation5 + $0x928] sm:$0xff] }
  0x8e   :  { %692 = vmatpush.msrb.mxu1 %v129_v41  ;;  %751 = vmatpush.msra.mxu2 %v276_v44  ;;  %v321_v41 = vld [vmem:[#allocation5 + $0x6e8] sm:$0xff]  ;;  %v318_v44 = vld [vmem:[#allocation5 + $0x6d0] sm:$0xff] }
  0x8f   :  { %715 = vmatpush.msrb.mxu3 %v168_v46  ;;  %730 = vmatpush.msra.mxu0 %v231_v47  ;;  %v841_v46 = vld [vmem:[#allocation8 + $0x60] sm:$0xff] }
  0x90   :  { %693 = vmatpush.msrb.mxu1 %v126_v45  ;;  %752 = vmatpush.msra.mxu2 %v273_v48  ;;  %v360_v45 = vld [vmem:[#allocation5 + $0x820] sm:$0xff]  ;;  %v315_v47 = vld [vmem:[#allocation5 + $0x6b8] sm:$0xff]  ;;  %v357_v48 = vld [vmem:[#allocation5 + $0x808] sm:$0xff] }
  0x91   :  { %716 = vmatpush.msrb.mxu3 %v165_v50  ;;  %731 = vmatpush.msra.mxu0 %v228_v51  ;;  %v312_v50 = vld [vmem:[#allocation5 + $0x6a0] sm:$0xff]  ;;  %v354_v51 = vld [vmem:[#allocation5 + $0x7f0] sm:$0xff] }
  0x92   :  { %694 = vmatpush.msrb.mxu1 %v123_v49  ;;  %753 = vmatpush.msra.mxu2 %v270_v52  ;;  %v840_v49 = vld [vmem:[#allocation8 + $0x58] sm:$0xff]  ;;  %v839_v52 = vld [vmem:[#allocation8 + $0x50] sm:$0xff] }
  0x93   :  { %717 = vmatpush.msrb.mxu3 %v162_v54  ;;  %732 = vmatpush.msra.mxu0 %v225_v55  ;;  %v838_v54 = vld [vmem:[#allocation8 + $0x48] sm:$0xff]  ;;  %v306_v55 = vld [vmem:[#allocation5 + $0x670] sm:$0xff] }
  0x94   :  { %695 = vmatpush.msrb.mxu1 %v120_v53  ;;  %754 = vmatpush.msra.mxu2 %v267_v56  ;;  %v351_v53 = vld [vmem:[#allocation5 + $0x7d8] sm:$0xff]  ;;  %v348_v56 = vld [vmem:[#allocation5 + $0x7c0] sm:$0xff] }
  0x95   :  { %718 = vmatpush.msrb.mxu3 %v159_v60  ;;  %733 = vmatpush.msra.mxu0 %v222_v61  ;;  %v303_v60 = vld [vmem:[#allocation5 + $0x658] sm:$0xff]  ;;  %v345_v61 = vld [vmem:[#allocation5 + $0x7a8] sm:$0xff] }
  0x96   :  { %696 = vmatpush.msrb.mxu1 %v117_v59  ;;  %755 = vmatpush.msra.mxu2 %v264_v62  ;;  %v837_v59 = vld [vmem:[#allocation8 + $0x40] sm:$0xff]  ;;  %v836_v62 = vld [vmem:[#allocation8 + $0x38] sm:$0xff] }
  0x97   :  { %719 = vmatpush.msrb.mxu3 %v156_v1  ;;  %734 = vmatpush.msra.mxu0 %v219_v2  ;;  %v342_v1 = vld [vmem:[#allocation5 + $0x790] sm:$0xff]  ;;  %v835_v2 = vld [vmem:[#allocation8 + $0x30] sm:$0xff] }
  0x98   :  { %697 = vmatpush.msrb.mxu1 %v114_v0  ;;  %756 = vmatpush.msra.mxu2 %v261_v3  ;;  %v300_v0 = vld [vmem:[#allocation5 + $0x640] sm:$0xff]  ;;  %v297_v3 = vld [vmem:[#allocation5 + $0x628] sm:$0xff] }
  0x99   :  { %720 = vmatpush.msrb.mxu3 %v153_v6  ;;  %735 = vmatpush.msra.mxu0 %v216_v7  ;;  %v833_v6 = vld [vmem:[#allocation8 + $0x20] sm:$0xff]  ;;  %v832_v7 = vld [vmem:[#allocation8 + $0x18] sm:$0xff] }
  0x9a   :  { %698 = vmatpush.msrb.mxu1 %v111_v5  ;;  %757 = vmatpush.msra.mxu2 %v258_v8  ;;  %v294_v5 = vld [vmem:[#allocation5 + $0x610] sm:$0xff]  ;;  %v831_v8 = vld [vmem:[#allocation8 + $0x10] sm:$0xff] }
  0x9b   :  { %721 = vmatpush.msrb.mxu3 %v150_v11  ;;  %736 = vmatpush.msra.mxu0 %v213_v13  ;;  %v829_v11 = vld [vmem:[#allocation8] sm:$0xff]  ;;  %v859_v13 = vld [vmem:[#allocation8 + $0xf0] sm:$0xff] }
  0x9c   :  { %699 = vmatpush.msrb.mxu1 %v108_v10  ;;  %758 = vmatpush.msra.mxu2 %v255_v15  ;;  %v830_v10 = vld [vmem:[#allocation8 + $0x8] sm:$0xff]  ;;  %v1220_v15 = vld [vmem:[#allocation7] sm:$0x7] }
  0x9d   :  { %786 = vmatpush.msra.mxu3 %v387_v12  ;;  %737 = vmatpush.msra.mxu0 %v210_v18  ;;  %v860_v12 = vld [vmem:[#allocation8 + $0xf8] sm:$0xff]  ;;  %v855_v18 = vld [vmem:[#allocation8 + $0xd0] sm:$0xff] }
  0x9e   :  { %700 = vmatpush.msrb.mxu1 %v105_v14  ;;  %759 = vmatpush.msra.mxu2 %v252_v20  ;;  %v857_v14 = vld [vmem:[#allocation8 + $0xe0] sm:$0xff] }
  0x9f   :  { %787 = vmatpush.msra.mxu3 %v384_v17  ;;  %738 = vmatpush.msra.mxu0 %v207_v24  ;;  %v856_v17 = vld [vmem:[#allocation8 + $0xd8] sm:$0xff] }
  0xa0   :  { %701 = vmatpush.msrb.mxu1 %v102_v19  ;;  %722 = vmatmul.f32.vlgmr.msrb.gmra.mxu3 %v1190_v63  ;;  %v844_v63 = vld [vmem:[#allocation8 + $0x78] sm:$0xff]  ;;  %v854_v19 = vld [vmem:[#allocation8 + $0xc8] sm:$0xff] }
  0xa1   :  { %788 = vmatpush.msra.mxu3 %v381_v23  ;;  %760 = vmatpush.msra.mxu2 %v249_v27 }
  0xa2   :  { %766 = vmatpush.msra.mxu1 %v339_v22  ;;  %739 = vmatpush.msra.mxu0 %v204_v28 }
  0xa3   :  { %789 = vmatpush.msra.mxu3 %v378_v26  ;;  %761 = vmatpush.msra.mxu2 %v246_v31  ;;  %v853_v26 = vld [vmem:[#allocation8 + $0xc0] sm:$0xff]  ;;  %v851_v31 = vld [vmem:[#allocation8 + $0xb0] sm:$0xff] }
  0xa4   :  { %767 = vmatpush.msra.mxu1 %v336_v25  ;;  %762 = vmatmul.f32.vlgmr.msra.gmra.mxu2 %v1187_v58  ;;  %v390_v58 = vld [vmem:[#allocation5 + $0x910] sm:$0xff] }
  0xa5   :  { %790 = vmatpush.msra.mxu3 %v375_v30  ;;  %702 = vmatmul.f32.vlgmr.msrb.gmra.mxu1 %v1185_v57  ;;  %v842_v57 = vld [vmem:[#allocation8 + $0x68] sm:$0xff]  ;;  %v852_v30 = vld [vmem:[#allocation8 + $0xb8] sm:$0xff] }
  0xa6   :  { %768 = vmatpush.msra.mxu1 %v333_v29  ;;  %740 = vmatpush.msra.mxu0 %v201_v34  ;;  %v850_v34 = vld [vmem:[#allocation8 + $0xa8] sm:$0xff] }
  0xa7   :  { %791 = vmatpush.msra.mxu3 %v372_v33  ;;  %881 = vmatpush.msrb.mxu2 %v844_v63 }
  0xa8   :  { %769 = vmatpush.msra.mxu1 %v330_v32  ;;  %741 = vmatpush.msra.mxu0 %v198_v37  ;;  %v849_v37 = vld [vmem:[#allocation8 + $0xa0] sm:$0xff] }
  0xa9   :  { %792 = vmatpush.msra.mxu3 %v369_v36  ;;  %742 = vmatmul.f32.vlgmr.msra.gmra.mxu0 %v1182_v4  ;;  %v309_v4 = vld [vmem:[#allocation5 + $0x688] sm:$0xff] }
  0xaa   :  { %770 = vmatpush.msra.mxu1 %v327_v35  ;;  %882 = vmatpush.msrb.mxu2 %v843_v40  ;;  %v847_v40 = vld [vmem:[#allocation8 + $0x90] sm:$0xff] }
  0xab   :  { %793 = vmatpush.msra.mxu3 %v366_v39  ;;  %820 = vmatpush.msrb.mxu0 %v393_v43  ;;  %v845_v43 = vld [vmem:[#allocation8 + $0x80] sm:$0xff] }
  0xac   :  { %771 = vmatpush.msra.mxu1 %v324_v38  ;;  %883 = vmatpush.msrb.mxu2 %v842_v57  ;;  %v848_v38 = vld [vmem:[#allocation8 + $0x98] sm:$0xff] }
  0xad   :  { %794 = vmatpush.msra.mxu3 %v363_v42  ;;  %821 = vmatpush.msrb.mxu0 %v390_v58  ;;  %v846_v42 = vld [vmem:[#allocation8 + $0x88] sm:$0xff]  ;;  %v876_v57 = vld [vmem:[#allocation8 + $0x178] sm:$0xff]  ;;  %v873_v58 = vld [vmem:[#allocation8 + $0x160] sm:$0xff] }
  0xae   :  { %772 = vmatpush.msra.mxu1 %v321_v41  ;;  %884 = vmatpush.msrb.mxu2 %v841_v46  ;;  %v872_v46 = vld [vmem:[#allocation8 + $0x158] sm:$0xff] }
  0xaf   :  { %795 = vmatpush.msra.mxu3 %v360_v45  ;;  %901 = vmatpush.msra.mxu0 %v860_v12  ;;  %v874_v45 = vld [vmem:[#allocation8 + $0x168] sm:$0xff]  ;;  %v861_v12 = vld [vmem:[#allocation8 + $0x100] sm:$0xff] }
  0xb0   :  { %773 = vmatpush.msra.mxu1 %v318_v44  ;;  %885 = vmatpush.msrb.mxu2 %v840_v49  ;;  %v875_v44 = vld [vmem:[#allocation8 + $0x170] sm:$0xff]  ;;  %v870_v49 = vld [vmem:[#allocation8 + $0x148] sm:$0xff] }
  0xb1   :  { %796 = vmatpush.msra.mxu3 %v357_v48  ;;  %963 = vmatmul.msk.f32.vlgmr.msrb.gmra.mxu0 %vm402_vm0, %v1194_v9  ;;  %v834_v9 = vld [vmem:[#allocation8 + $0x28] sm:$0xff]  ;;  %v397_v48 = vperm.slane %v1220_v15, 1 }
  0xb2   :  { %774 = vmatpush.msra.mxu1 %v315_v47  ;;  %886 = vmatpush.msrb.mxu2 %v839_v52  ;;  %v871_v47 = vld [vmem:[#allocation8 + $0x150] sm:$0xff] }
  0xb3   :  { %797 = vmatpush.msra.mxu3 %v354_v51  ;;  %902 = vmatpush.msra.mxu0 %v859_v13  ;;  %v398_v13 = vperm.slane %v1220_v15, 2 }
  0xb4   :  { %775 = vmatpush.msra.mxu1 %v312_v50  ;;  %887 = vmatpush.msrb.mxu2 %v838_v54 }
  0xb5   :  { %798 = vmatpush.msra.mxu3 %v351_v53 }
  0xb6   :  { %776 = vmatpush.msra.mxu1 %v309_v4  ;;  %888 = vmatpush.msrb.mxu2 %v837_v59 }
  0xb7   :  { %799 = vmatpush.msra.mxu3 %v348_v56 }
  0xb8   :  { %777 = vmatpush.msra.mxu1 %v306_v55  ;;  %889 = vmatpush.msrb.mxu2 %v836_v62  ;;  %v869_v62 = vld [vmem:[#allocation8 + $0x140] sm:$0xff] }
  0xb9   :  { %800 = vmatpush.msra.mxu3 %v345_v61 }
  0xba   :  { %778 = vmatpush.msra.mxu1 %v303_v60  ;;  %890 = vmatpush.msrb.mxu2 %v835_v2  ;;  %v868_v2 = vld [vmem:[#allocation8 + $0x138] sm:$0xff] }
  0xbb   :  { %801 = vmatpush.msra.mxu3 %v342_v1 }
  0xbc   :  { %779 = vmatpush.msra.mxu1 %v300_v0  ;;  %802 = vmatmul.f32.vlgmr.msra.gmra.mxu3 %v1201_v21  ;;  %v858_v21 = vld [vmem:[#allocation8 + $0xe8] sm:$0xff] }
  0xbd   :  { %891 = vmatpush.msrb.mxu2 %v834_v9  ;;  %903 = vmatpush.msra.mxu0 %v858_v21 }
  0xbe   :  { %780 = vmatpush.msra.mxu1 %v297_v3  ;;  %v463_v24 = vpop.f32.mrf.mxu2 }
  0xbf   :  { %892 = vmatpush.msrb.mxu2 %v833_v6  ;;  %904 = vmatpush.msra.mxu0 %v857_v14  ;;  %v866_v6 = vld [vmem:[#allocation8 + $0x128] sm:$0xff] }
  0xc0   :  { %781 = vmatpush.msra.mxu1 %v294_v5  ;;  %v867_v5 = vld [vmem:[#allocation8 + $0x130] sm:$0xff] }
  0xc1   :  { %782 = vmatmul.f32.vlgmr.msra.gmra.mxu1 %v1198_v16  ;;  %893 = vmatpush.msrb.mxu2 %v832_v7  ;;  %v396_v16 = vperm.slane %v1220_v15, 0  ;;  %v865_v7 = vld [vmem:[#allocation8 + $0x120] sm:$0xff] }
  0xc2   :  { %905 = vmatpush.msra.mxu0 %v856_v17  ;;  %921 = vmatpush.msrb.mxu1 %v876_v57 }
  0xc3   :  { %894 = vmatpush.msrb.mxu2 %v831_v8  ;;  %v864_v8 = vld [vmem:[#allocation8 + $0x118] sm:$0xff] }
  0xc4   :  { %906 = vmatpush.msra.mxu0 %v855_v18  ;;  %922 = vmatpush.msrb.mxu1 %v875_v44 }
  0xc5   :  { %895 = vmatpush.msrb.mxu2 %v830_v10  ;;  %v863_v10 = vld [vmem:[#allocation8 + $0x110] sm:$0xff] }
  0xc6   :  { %907 = vmatpush.msra.mxu0 %v854_v19  ;;  %923 = vmatpush.msrb.mxu1 %v874_v45 }
  0xc7   :  { %896 = vmatpush.msrb.mxu2 %v829_v11  ;;  %v862_v11 = vld [vmem:[#allocation8 + $0x108] sm:$0xff] }
  0xc8   :  { %908 = vmatpush.msra.mxu0 %v853_v26  ;;  %924 = vmatpush.msrb.mxu1 %v873_v58 }
  0xca   :  { %909 = vmatpush.msra.mxu0 %v852_v30  ;;  %925 = vmatpush.msrb.mxu1 %v872_v46  ;;  %v974_v30 = vld [vmem:[#allocation10] ss:$0 sm:$0xff] }
  0xcc   :  { %910 = vmatpush.msra.mxu0 %v851_v31  ;;  %926 = vmatpush.msrb.mxu1 %v871_v47 }
  0xce   :  { %911 = vmatpush.msra.mxu0 %v850_v34  ;;  %927 = vmatpush.msrb.mxu1 %v870_v49 }
  0xd0   :  { %912 = vmatpush.msra.mxu0 %v849_v37  ;;  %928 = vmatpush.msrb.mxu1 %v869_v62 }
  0xd2   :  { %v423_v20 = vpop.f32.mrf.mxu0  ;;  %913 = vmatpush.msra.mxu0 %v848_v38  ;;  %929 = vmatpush.msrb.mxu1 %v868_v2 }
  0xd3   :  { %v424_v22 = vadd.f32 %v423_v20, %v396_v16 }
  0xd4   :  { %914 = vmatpush.msra.mxu0 %v847_v40  ;;  %930 = vmatpush.msrb.mxu1 %v867_v5 }
  0xd5   :  { %v443_v23 = vpop.f32.mrf.mxu1 }
  0xd6   :  { %v444_v25 = vadd.f32 %v443_v23, %v424_v22  ;;  %915 = vmatpush.msra.mxu0 %v846_v42  ;;  %931 = vmatpush.msrb.mxu1 %v866_v6 }
  0xd8   :  { %v464_v27 = vadd.f32 %v463_v24, %v444_v25  ;;  %916 = vmatpush.msra.mxu0 %v845_v43  ;;  %932 = vmatpush.msrb.mxu1 %v865_v7 }
  0xd9   :  { %v483_v28 = vpop.f32.mrf.mxu3 }
  0xda   :  { %v484_v29 = vadd.f32 %v483_v28, %v464_v27  ;;  %933 = vmatpush.msrb.mxu1 %v864_v8 }
  0xdc   :  { %934 = vmatpush.msrb.mxu1 %v863_v10 }
  0xdd   :  { %v503_v32 = vpop.f32.mrf.mxu0 }
  0xde   :  { %v504_v33 = vadd.f32 %v503_v32, %v484_v29  ;;  %935 = vmatpush.msrb.mxu1 %v862_v11 }
  0xe0   :  { %v523_v35 = vpop.f32.mrf.mxu1  ;;  %v543_v36 = vpop.f32.mrf.mxu2  ;;  %936 = vmatpush.msrb.mxu1 %v861_v12 }
  0xe1   :  { %v524_v63 = vadd.f32 %v523_v35, %v504_v33 }
  0xe3   :  { %v544_v39 = vadd.f32 %v543_v36, %v524_v63 }
  0xe5   :  { %v826_v41 = vmax.f32 %v544_v39, 0.0 }
  0xe7   :  { %897 = vmatmul.f32.vlgmr.msrb.gmra.mxu2 %v826_v41 }
  0xf6   :  { %v563_v50 = vpop.f32.mrf.mxu3 }
  0xf7   :  { %v564_v51 = vadd.f32 %v563_v50, %v397_v48 }
  0xf9   :  { %v583_v52 = vpop.f32.mrf.mxu2 }
  0xfa   :  { %v584_v4 = vadd.f32 %v583_v52, %v564_v51 }
  0xfc   :  { %v603_v53 = vpop.f32.mrf.mxu0 }
  0xfd   :  { %v604_v54 = vadd.f32 %v603_v53, %v584_v4 }
  0xfe   :  { %v623_v55 = vpop.f32.mrf.mxu1 }
  0xff   :  { %v624_v56 = vadd.f32 %v623_v55, %v604_v54 }
 0x101   :  { %v643_v59 = vpop.f32.mrf.mxu3 }
 0x102   :  { %v644_v60 = vadd.f32 %v643_v59, %v624_v56 }
 0x103   :  { %v663_v61 = vpop.f32.mrf.mxu2 }
 0x104   :  { %v664_v0 = vadd.f32 %v663_v61, %v644_v60  ;;  %v683_v1 = vpop.f32.mrf.mxu0 }
 0x106   :  { %v684_v3 = vadd.f32 %v683_v1, %v664_v0 }
 0x108   :  { %v827_v9 = vmax.f32 %v684_v3, 0.0 }
 0x10a   :  { %917 = vmatmul.f32.vlgmr.msra.gmra.mxu0 %v827_v9 }
 0x122   :  { %v703_v21 = vpop.f32.mrf.mxu1 }
 0x123   :  { %v704_v14 = vadd.f32 %v703_v21, %v398_v13  ;;  %v723_v17 = vpop.f32.mrf.mxu3 }
 0x125   :  { %v724_v16 = vadd.f32 %v723_v17, %v704_v14 }
 0x126   :  { %v743_v18 = vpop.f32.mrf.mxu0 }
 0x127   :  { %v744_v19 = vadd.f32 %v743_v18, %v724_v16  ;;  %v763_v20 = vpop.f32.mrf.mxu2 }
 0x129   :  { %v764_v22 = vadd.f32 %v763_v20, %v744_v19 }
 0x12e   :  { %v823_v26 = vpop.f32.mrf.mxu0 }
 0x13e   :  { %v783_v23 = vpop.f32.mrf.mxu1 }
 0x13f   :  { %v784_v24 = vadd.f32 %v783_v23, %v764_v22  ;;  %v803_v25 = vpop.f32.mrf.mxu3 }
 0x141   :  { %v804_v27 = vadd.f32 %v803_v25, %v784_v24 }
 0x143   :  { %v824_v28 = vadd.f32 %v823_v26, %v804_v27 }
 0x145   :  { %v828_v29 = vmax.f32 %v824_v28, 0.0 }
 0x147   :  { %937 = vmatmul.f32.vlgmr.msrb.gmra.mxu1 %v828_v29 }
 0x16a   :  { %v898_v31 = vpop.f32.mrf.mxu2 }
 0x16b   :  { %v899_v15 = vadd.f32 %v974_v30, %v898_v31 }
 0x187   :  { %v918_v32 = vpop.f32.mrf.mxu0 }
 0x188   :  { %v919_v33 = vadd.f32 %v918_v32, %v899_v15 }
 0x1c4   :  { %v938_v34 = vpop.f32.mrf.mxu1 }
 0x1c5   :  { %v939_v35 = vadd.f32 %v938_v34, %v919_v33 }
 0x1c7   :  { %941 = vst [vmem:[#allocation11] sm:$0xff] %v939_v35 }
 0x1c8   :  { %952 = dma.vmem_to_hbm [thread:$0]  %s948_s4, 128, %s950_s21, [#allocation4]  }
 0x1c9   :  { %1125 = dma.done.wait [#allocation4], 128  }
 0x1ca   :  { %1126 = vsyncadd [#allocation4], 4294967168 }
 0x1cb   :  { %957 = vsyncpa [#allocation3], 1 }
 0x1cc   :  { %958 = vsyncpa [#allocation6], 1 }
 0x1cd   :  { %959 = vsyncpa [#allocation9], 1 }
 0x1ce   :  { %960 = vsyncpa [#allocation4], 1 }

</bundles_post_ra>
